<compile_context>
chip_gen: v7x
topology: tpu7x:2x2x1
jax: 0.10.0
libtpu: 0.0.40
codegen_flags: <defaults>
</compile_context>

<pallas_src>
import functools

import jax
import jax.numpy as jnp
import numpy as np
from jax.experimental import pallas as pl
from jax.experimental.pallas import tpu as pltpu

LANE = 128


def _rup(v, m):
    return ((v + m - 1) // m) * m


def _silu(y):
    # SiLU: exp and approximate reciprocal both issue on the EUP slot.
    return y * pl.reciprocal(1.0 + jnp.exp(-y), approx=True)


# ---------------------------------------------------------------------------
# Pallas kernels
# ---------------------------------------------------------------------------
def _pw_kernel(x_ref, w_ref, s_ref, b_ref, o_ref):
    """Fused 1x1 conv (bf16 matmul) + folded-BN scale/bias + SiLU."""
    y = jnp.dot(x_ref[...], w_ref[...], preferred_element_type=jnp.float32)
    y = y * s_ref[...] + b_ref[...]
    o_ref[...] = _silu(y).astype(o_ref.dtype)


def _bottleneck_kernel(tc_ref, tp_ref, tn_ref, w1_ref, s1_ref, b1_ref,
                       w2_ref, s2_ref, b2_ref, o_ref, a_scr, acc_ref,
                       *, tr, Wp, W, bpi):
    """Fused Bottleneck: 1x1 conv+BN+SiLU -> 3x3 conv+BN+SiLU -> residual add.

    tc_ref : (tr*Wp, Cm)  center tile (tr image rows, padded width)
    tp_ref : (Wp, Cm)     previous image row (halo), clamped at array start
    tn_ref : (Wp, Cm)     next image row (halo), clamped at array end
    a_scr  : ((tr+2)*Wp + 16, Cm) f32 VMEM scratch holding the 1x1-conv output
             with an 8-row zero apron on each side (shifted tap windows stay
             in range).
    acc_ref: (tr*Wp, Cm) f32 VMEM accumulator for the 9 tap matmuls.
    """
    Cm = o_ref.shape[1]
    tm = tr * Wp
    Hr = (tr + 2) * Wp

    i = pl.program_id(0)
    is_top = (i % bpi) == 0            # first block of an image -> no row above
    is_bot = (i % bpi) == (bpi - 1)    # last block of an image  -> no row below

    def a_piece(t_bf, keep):
        # 1x1 conv + BN + SiLU, then zero the width-padding columns (and the
        # whole halo row when it lies outside the image) so the 3x3 conv sees
        # exact SAME zero padding.
        rows = t_bf.shape[0]
        v = jnp.dot(t_bf, w1_ref[...], preferred_element_type=jnp.float32)
        v = _silu(v * s1_ref[...] + b1_ref[...])
        col = jax.lax.broadcasted_iota(jnp.int32, (rows, 1), 0) % Wp
        ok = (col >= 1) & (col <= W) & keep
        return jnp.where(ok, v, 0.0)

    zeros8 = jnp.zeros((8, Cm), jnp.float32)
    a_scr[pl.ds(0, 8), :] = zeros8
    a_scr[pl.ds(8 + Hr, 8), :] = zeros8
    a_scr[pl.ds(8, Wp), :] = a_piece(tp_ref[...], jnp.logical_not(is_top))
    a_scr[pl.ds(8 + Wp, tm), :] = a_piece(tc_ref[...], True)
    a_scr[pl.ds(8 + Wp + tm, Wp), :] = a_piece(tn_ref[...], jnp.logical_not(is_bot))

    # 3x3 conv = 9 shifted-window tap matmuls accumulated in f32 VMEM scratch.
    for k in range(9):
        dy, dx = divmod(k, 3)
        tap = a_scr[pl.ds(7 + dy * Wp + dx, tm), :].astype(jnp.bfloat16)
        contrib = jnp.dot(tap, w2_ref[k], preferred_element_type=jnp.float32)
        if k == 0:
            acc_ref[...] = contrib
        else:
            acc_ref[...] += contrib

    y = _silu(acc_ref[...] * s2_ref[...] + b2_ref[...])
    o_ref[...] = (tc_ref[...].astype(jnp.float32) + y).astype(o_ref.dtype)


def _head_kernel(t_ref, x_ref, w3_ref, w2c_ref, s1_ref, b1_ref, s2_ref, b2_ref,
                 w4a_ref, w4b_ref, s4_ref, b4_ref, o_ref):
    """Fused CSP head: cv3(t), cv2(x), implicit concat -> BN -> SiLU -> cv4+BN+SiLU."""
    y1 = jnp.dot(t_ref[...], w3_ref[...], preferred_element_type=jnp.float32)
    y2 = jnp.dot(x_ref[...], w2c_ref[...], preferred_element_type=jnp.float32)
    z1 = _silu(y1 * s1_ref[...] + b1_ref[...]).astype(jnp.bfloat16)
    z2 = _silu(y2 * s2_ref[...] + b2_ref[...]).astype(jnp.bfloat16)
    y = (jnp.dot(z1, w4a_ref[...], preferred_element_type=jnp.float32) +
         jnp.dot(z2, w4b_ref[...], preferred_element_type=jnp.float32))
    y = y * s4_ref[...] + b4_ref[...]
    o_ref[...] = _silu(y).astype(o_ref.dtype)


# ---------------------------------------------------------------------------
# pallas_call wrappers
# ---------------------------------------------------------------------------
_PARALLEL = pltpu.CompilerParams(dimension_semantics=("parallel",))


def _pw_call(x2d, w, s, b, tm):
    M, Ci = x2d.shape
    Co = w.shape[1]
    row = lambda i: (i, 0)
    full = lambda i: (0, 0)
    return pl.pallas_call(
        _pw_kernel,
        grid=(M // tm,),
        in_specs=[pl.BlockSpec((tm, Ci), row),
                  pl.BlockSpec((Ci, Co), full),
                  pl.BlockSpec((1, Co), full),
                  pl.BlockSpec((1, Co), full)],
        out_specs=pl.BlockSpec((tm, Co), row),
        out_shape=jax.ShapeDtypeStruct((M, Co), jnp.bfloat16),
        compiler_params=_PARALLEL,
    )(x2d, w, s, b)


def _bottleneck_call(t2d, w1, s1, b1, w2, s2, b2, *, NH, Wp, tr, H, W):
    M, Cm = t2d.shape
    tm = tr * Wp
    grid = (NH // tr,)
    bpi = H // tr
    kern = functools.partial(_bottleneck_kernel, tr=tr, Wp=Wp, W=W, bpi=bpi)
    row = lambda i: (i, 0)
    full = lambda i: (0, 0)
    prev_map = lambda i: (jnp.maximum(i * tr - 1, 0), 0)
    next_map = lambda i: (jnp.minimum(i * tr + tr, NH - 1), 0)
    return pl.pallas_call(
        kern,
        grid=grid,
        in_specs=[pl.BlockSpec((tm, Cm), row),      # center tile of t
                  pl.BlockSpec((Wp, Cm), prev_map),  # halo: previous image row
                  pl.BlockSpec((Wp, Cm), next_map),  # halo: next image row
                  pl.BlockSpec((Cm, Cm), full),      # w1
                  pl.BlockSpec((1, Cm), full),       # s1
                  pl.BlockSpec((1, Cm), full),       # b1
                  pl.BlockSpec((9, Cm, Cm), lambda i: (0, 0, 0)),  # w2 taps
                  pl.BlockSpec((1, Cm), full),       # s2
                  pl.BlockSpec((1, Cm), full)],      # b2
        out_specs=pl.BlockSpec((tm, Cm), row),
        out_shape=jax.ShapeDtypeStruct((M, Cm), jnp.bfloat16),
        scratch_shapes=[pltpu.VMEM(((tr + 2) * Wp + 16, Cm), jnp.float32),
                        pltpu.VMEM((tm, Cm), jnp.float32)],
        compiler_params=_PARALLEL,
    )(t2d, t2d, t2d, w1, s1, b1, w2, s2, b2)


def _head_call(t2d, x2d, kp, tm):
    M, Cm = t2d.shape
    Ci = x2d.shape[1]
    Co = kp['cv4a_w'].shape[1]
    row = lambda i: (i, 0)
    full = lambda i: (0, 0)
    return pl.pallas_call(
        _head_kernel,
        grid=(M // tm,),
        in_specs=[pl.BlockSpec((tm, Cm), row),
                  pl.BlockSpec((tm, Ci), row),
                  pl.BlockSpec((Cm, Cm), full),
                  pl.BlockSpec((Ci, Cm), full),
                  pl.BlockSpec((1, Cm), full), pl.BlockSpec((1, Cm), full),
                  pl.BlockSpec((1, Cm), full), pl.BlockSpec((1, Cm), full),
                  pl.BlockSpec((Cm, Co), full), pl.BlockSpec((Cm, Co), full),
                  pl.BlockSpec((1, Co), full), pl.BlockSpec((1, Co), full)],
        out_specs=pl.BlockSpec((tm, Co), row),
        out_shape=jax.ShapeDtypeStruct((M, Co), jnp.float32),
        compiler_params=_PARALLEL,
    )(t2d, x2d, kp['cv3_w'], kp['cv2_w'],
      kp['bn_s1'], kp['bn_b1'], kp['bn_s2'], kp['bn_b2'],
      kp['cv4a_w'], kp['cv4b_w'], kp['cv4_s'], kp['cv4_b'])


# ---------------------------------------------------------------------------
# Full BottleneckCSP forward
# ---------------------------------------------------------------------------
def _pick_tr(H, Wp, target_rows=512):
    """Largest divisor of H such that the tile has <= target_rows pixel rows."""
    tr = 1
    for d in range(1, H + 1):
        if H % d == 0 and d * Wp <= target_rows:
            tr = d
    return tr


def bottleneck_csp_forward(x_nchw, kp, n):
    N, Ci, H, W = x_nchw.shape
    Cip, Cmp, Cop = kp['Cip'], kp['Cmp'], kp['Cop']
    Wp = _rup(W + 2, 8)
    NH = N * H
    tr = _pick_tr(H, Wp)
    tm = tr * Wp
    M = NH * Wp

    # NCHW -> padded pixel-major bf16 slab (zero width-pad columns, zero-padded channels).
    x_nhwc = jnp.transpose(x_nchw, (0, 2, 3, 1))
    x_pad = jnp.zeros((N, H, Wp, Cip), jnp.bfloat16)
    x_pad = x_pad.at[:, :, 1:W + 1, :Ci].set(x_nhwc.astype(jnp.bfloat16))
    x2d = x_pad.reshape(M, Cip)

    # cv1: 1x1 conv + BN + SiLU
    t = _pw_call(x2d, kp['cv1_w'], kp['cv1_s'], kp['cv1_b'], tm)

    # m: n fused Bottleneck blocks (shortcut=True, c_in == c_out -> residual add)
    for i in range(n):
        blk = kp['m'][i]
        t = _bottleneck_call(t, blk['w1'], blk['s1'], blk['b1'],
                             blk['w2'], blk['s2'], blk['b2'],
                             NH=NH, Wp=Wp, tr=tr, H=H, W=W)

    # cv3 / cv2 / concat -> BN -> SiLU -> cv4 + BN + SiLU, fully fused
    out2d = _head_call(t, x2d, kp, tm)

    c_out = kp['c_out']
    out = out2d.reshape(N, H, Wp, Cop)[:, :, 1:W + 1, :c_out]
    return jnp.transpose(out, (0, 3, 1, 2))


# ---------------------------------------------------------------------------
# Parameter preparation (pad channels to 128 lanes, cast weights to bf16)
# ---------------------------------------------------------------------------
def _pad2(w, r, c):
    out = jnp.zeros((r, c), jnp.float32)
    return out.at[:w.shape[0], :w.shape[1]].set(w)


def prepare_kernel_params(p, c_in, c_out, cm, n):
    Cip = _rup(c_in, LANE)
    Cmp = _rup(cm, LANE)
    Cop = _rup(c_out, LANE)

    wpad = lambda w, r, c: _pad2(w, r, c).astype(jnp.bfloat16)
    sbpad = lambda s, c: _pad2(s, 1, c).astype(jnp.float32)

    kp = {
        'Cip': Cip, 'Cmp': Cmp, 'Cop': Cop, 'c_out': c_out,
        'cv1_w': wpad(p['cv1_w'], Cip, Cmp),
        'cv1_s': sbpad(p['cv1_s'], Cmp), 'cv1_b': sbpad(p['cv1_b'], Cmp),
        'cv2_w': wpad(p['cv2_w'], Cip, Cmp),
        'cv3_w': wpad(p['cv3_w'], Cmp, Cmp),
        'cv4a_w': wpad(p['cv4_w'][:cm], Cmp, Cop),
        'cv4b_w': wpad(p['cv4_w'][cm:], Cmp, Cop),
        'cv4_s': sbpad(p['cv4_s'], Cop), 'cv4_b': sbpad(p['cv4_b'], Cop),
        'bn_s1': sbpad(p['bn_s'][:, :cm], Cmp), 'bn_b1': sbpad(p['bn_b'][:, :cm], Cmp),
        'bn_s2': sbpad(p['bn_s'][:, cm:], Cmp), 'bn_b2': sbpad(p['bn_b'][:, cm:], Cmp),
        'm': [],
    }
    for i in range(n):
        blk = p['m'][i]
        w2p = (jnp.zeros((9, Cmp, Cmp), jnp.float32)
               .at[:, :cm, :cm].set(blk['w2']).astype(jnp.bfloat16))
        kp['m'].append({
            'w1': wpad(blk['w1'], Cmp, Cmp),
            's1': sbpad(blk['s1'], Cmp), 'b1': sbpad(blk['b1'], Cmp),
            'w2': w2p,
            's2': sbpad(blk['s2'], Cmp), 'b2': sbpad(blk['b2'], Cmp),
        })
    return kp


# ---------------------------------------------------------------------------
# Pure-JAX reference (f32, for correctness check)
# ---------------------------------------------------------------------------
def ref_forward(x_nhwc, p, n, cm):
    silu = lambda v: v * jax.nn.sigmoid(v)
    pw = lambda v, w: jnp.einsum('nhwc,cd->nhwd', v, w)

    t = silu(pw(x_nhwc, p['cv1_w']) * p['cv1_s'] + p['cv1_b'])
    for i in range(n):
        blk = p['m'][i]
        a = silu(pw(t, blk['w1']) * blk['s1'] + blk['b1'])
        w3 = blk['w2'].reshape(3, 3, cm, cm)  # HWIO
        c = jax.lax.conv_general_dilated(
            a, w3, (1, 1), 'SAME',
            dimension_numbers=('NHWC', 'HWIO', 'NHWC'))
        t = t + silu(c * blk['s2'] + blk['b2'])
    y1 = pw(t, p['cv3_w'])
    y2 = pw(x_nhwc, p['cv2_w'])
    cat = jnp.concatenate([y1, y2], axis=-1)
    z = silu(cat * p['bn_s'] + p['bn_b'])
    return silu(pw(z, p['cv4_w']) * p['cv4_s'] + p['cv4_b'])


# ---------------------------------------------------------------------------
# Deterministic parameter init (folded BN = scale/bias, inference semantics)
# ---------------------------------------------------------------------------
def init_params(key, c_in, c_out, e, n):
    cm = int(c_out * e)
    keys = iter(jax.random.split(key, 7 + 4 * n))

    def w(shape):
        return (0.2 * jax.random.normal(next(keys), shape)).astype(jnp.float32)

    def bn(c):
        k1, k2, k3, k4 = jax.random.split(next(keys), 4)
        gamma = 1.0 + 0.1 * jax.random.normal(k1, (c,))
        beta = 0.1 * jax.random.normal(k2, (c,))
        mean = 0.1 * jax.random.normal(k3, (c,))
        var = jnp.abs(jax.random.normal(k4, (c,))) + 0.5
        s = gamma / jnp.sqrt(var + 1e-5)
        b = beta - mean * s
        return (s.reshape(1, c).astype(jnp.float32),
                b.reshape(1, c).astype(jnp.float32))

    p = {}
    p['cv1_w'] = w((c_in, cm)); p['cv1_s'], p['cv1_b'] = bn(cm)
    p['cv2_w'] = w((c_in, cm))                       # plain conv, no BN
    p['cv3_w'] = w((cm, cm))                         # plain conv, no BN
    p['cv4_w'] = w((2 * cm, c_out)); p['cv4_s'], p['cv4_b'] = bn(c_out)
    p['bn_s'], p['bn_b'] = bn(2 * cm)                # BN on the concat
    p['m'] = []
    for _ in range(n):
        blk = {}
        blk['w1'] = w((cm, cm)); blk['s1'], blk['b1'] = bn(cm)
        blk['w2'] = w((9, cm, cm)); blk['s2'], blk['b2'] = bn(cm)
        p['m'].append(blk)
    return p, cm


# ---------------------------------------------------------------------------
if __name__ == "__main__":
    key = jax.random.PRNGKey(0)
    kparam_key, kx = jax.random.split(key)

    c_in, c_out, expansion, n = 4, 8, 0.5, 2
    N, H, W = 2, 16, 16

    params, cm = init_params(kparam_key, c_in, c_out, expansion, n)
    kparams = prepare_kernel_params(params, c_in, c_out, cm, n)
    x = jax.random.normal(kx, (N, c_in, H, W), jnp.float32)

    out = bottleneck_csp_forward(x, kparams, n)
    out = jax.block_until_ready(out)
    assert out.shape == (N, c_out, H, W)

    # correctness check against a pure-JAX f32 reference (kernel path uses bf16
    # matmuls + approx reciprocal -> loosened tolerance)
    ref = ref_forward(jnp.transpose(x, (0, 2, 3, 1)), params, n, cm)
    ref_nchw = jnp.transpose(ref, (0, 3, 1, 2))
    np.testing.assert_allclose(np.asarray(out, dtype=np.float32),
                               np.asarray(ref_nchw), rtol=5e-2, atol=2e-2)

    print("KERNEL_OK")
</pallas_src>

<mosaic_0001>
module attributes {stable_mosaic.version = 11 : i64} {
  func.func @_pw_kernel(%arg0: i32, %arg1: memref<384x128xbf16, #tpu.memory_space<vmem>>, %arg2: memref<128x128xbf16, #tpu.memory_space<vmem>>, %arg3: memref<1x128xf32, #tpu.memory_space<vmem>>, %arg4: memref<1x128xf32, #tpu.memory_space<vmem>>, %arg5: memref<384x128xbf16, #tpu.memory_space<vmem>>) attributes {dimension_semantics = [#tpu.dimension_semantics<parallel>], iteration_bounds = array<i64: 2>, scalar_prefetch = 0 : i64, scratch_operands = 0 : i64, tpu.core_type = #tpu.core_type<tc>, window_params = [{transform_indices = @transform_0, window_bounds = array<i64: 384, 128>}, {pipeline_mode = #tpu.pipeline_mode<synchronous>, transform_indices = @transform_1, window_bounds = array<i64: 128, 128>}, {pipeline_mode = #tpu.pipeline_mode<synchronous>, transform_indices = @transform_2, window_bounds = array<i64: 1, 128>}, {pipeline_mode = #tpu.pipeline_mode<synchronous>, transform_indices = @transform_3, window_bounds = array<i64: 1, 128>}, {transform_indices = @transform_4, window_bounds = array<i64: 384, 128>}]} {
    %c0 = arith.constant 0 : index
    %c0_0 = arith.constant 0 : index
    %0 = vector.load %arg1[%c0, %c0_0] : memref<384x128xbf16, #tpu.memory_space<vmem>>, vector<384x128xbf16>
    %c0_1 = arith.constant 0 : index
    %c0_2 = arith.constant 0 : index
    %1 = vector.load %arg2[%c0_1, %c0_2] : memref<128x128xbf16, #tpu.memory_space<vmem>>, vector<128x128xbf16>
    %cst = arith.constant dense<0.000000e+00> : vector<384x128xf32>
    %2 = tpu.matmul %0, %1, %cst {dimension_numbers = #tpu.dot_dimension_numbers<[1], [0], [0], [1], [0, 0, 1, 1], [], []>} : vector<384x128xbf16>, vector<128x128xbf16>, vector<384x128xf32> -> vector<384x128xf32>
    %c0_3 = arith.constant 0 : index
    %c0_4 = arith.constant 0 : index
    %3 = vector.load %arg3[%c0_3, %c0_4] : memref<1x128xf32, #tpu.memory_space<vmem>>, vector<1x128xf32>
    %4 = vector.broadcast %3 : vector<1x128xf32> to vector<384x128xf32>
    %5 = arith.mulf %2, %4 : vector<384x128xf32>
    %c0_5 = arith.constant 0 : index
    %c0_6 = arith.constant 0 : index
    %6 = vector.load %arg4[%c0_5, %c0_6] : memref<1x128xf32, #tpu.memory_space<vmem>>, vector<1x128xf32>
    %7 = vector.broadcast %6 : vector<1x128xf32> to vector<384x128xf32>
    %8 = arith.addf %5, %7 : vector<384x128xf32>
    %cst_7 = arith.constant 0.000000e+00 : f32
    %9 = vector.broadcast %cst_7 : f32 to vector<384x128xf32>
    %10 = arith.subf %9, %8 : vector<384x128xf32>
    %11 = math.exp %10 : vector<384x128xf32>
    %cst_8 = arith.constant 1.000000e+00 : f32
    %12 = vector.broadcast %cst_8 : f32 to vector<384x128xf32>
    %13 = arith.addf %12, %11 : vector<384x128xf32>
    %14 = tpu.reciprocal %13 {approx = true} : vector<384x128xf32> -> vector<384x128xf32>
    %15 = arith.mulf %8, %14 : vector<384x128xf32>
    %16 = arith.truncf %15 : vector<384x128xf32> to vector<384x128xbf16>
    %c0_9 = arith.constant 0 : index
    %c0_10 = arith.constant 0 : index
    %17 = vector.load %arg5[%c0_9, %c0_10] : memref<384x128xbf16, #tpu.memory_space<vmem>>, vector<384x128xbf16>
    tpu.vector_store %arg5[%c0_9, %c0_10], %16 {strides = array<i32>} : memref<384x128xbf16, #tpu.memory_space<vmem>>, vector<384x128xbf16>,
    return
  }
  func.func @transform_0(%arg0: i32) -> (i32, i32) {
    %c0_i32 = arith.constant 0 : i32
    %c0_i32_0 = arith.constant 0 : i32
    return %arg0, %c0_i32 : i32, i32
  }
  func.func @transform_1(%arg0: i32) -> (i32, i32) {
    %c0_i32 = arith.constant 0 : i32
    %c0_i32_0 = arith.constant 0 : i32
    %c0_i32_1 = arith.constant 0 : i32
    return %c0_i32, %c0_i32_0 : i32, i32
  }
  func.func @transform_2(%arg0: i32) -> (i32, i32) {
    %c0_i32 = arith.constant 0 : i32
    %c0_i32_0 = arith.constant 0 : i32
    %c0_i32_1 = arith.constant 0 : i32
    return %c0_i32, %c0_i32_0 : i32, i32
  }
  func.func @transform_3(%arg0: i32) -> (i32, i32) {
    %c0_i32 = arith.constant 0 : i32
    %c0_i32_0 = arith.constant 0 : i32
    %c0_i32_1 = arith.constant 0 : i32
    return %c0_i32, %c0_i32_0 : i32, i32
  }
  func.func @transform_4(%arg0: i32) -> (i32, i32) {
    %c0_i32 = arith.constant 0 : i32
    %c0_i32_0 = arith.constant 0 : i32
    return %arg0, %c0_i32 : i32, i32
  }
}

</mosaic_0001>

<bundles_post_ra>
// kernel: tpu_custom_call.1
= control target key start
LH: loop header
LB: loop body
LE: loop exit
PB: predicated region body
PF: predicated region fallthrough
CT: control target
= control target key end

     0   :  { %9 = vsyncpa [#allocation3], 0  ;;  %s2984_s0 = inlined_call_operand.hbm [shape: bf16[768,128], index: 0, kind: input, shape index: {}]   ;;  %s2985_s1 = inlined_call_operand.hbm [shape: bf16[128,128], index: 1, kind: input, shape index: {}]   ;;  %s2986_s2 = inlined_call_operand.vmem [shape: f32[1,128], index: 2, kind: input, shape index: {}]   ;;  %s2987_s3 = inlined_call_operand.vmem [shape: f32[1,128], index: 3, kind: input, shape index: {}]   ;;  %s2988_s4 = inlined_call_operand.hbm [shape: bf16[768,128], index: 4, kind: output, shape index: {}]  }
   0x1   :  { %11 = vsyncpa [#allocation3 + $0x1], 0 }
   0x2   :  { %12 = vsyncpa [#allocation6], 0 }
   0x3   :  { %13 = vsyncpa [#allocation4], 0 }
   0x4   :  { %15 = vsyncpa [#allocation4 + $0x1], 0  ;;  %s2296_s15 = smov 0   ;;  %s2298_s16 = smov 0  }
   0x5   :  { %s2300_s17 = smov 0   ;;  %s2302_s18 = smov 0  }
   0x6 LB: > { %s2317_s19 = sadd.s32 4294967295, %s2262_s18   ;;  %s1450_s20 = sadd.s32 4294967294, %s2262_s18   ;;  %s2262_s18 = sphi %s2302_s18, %s3008_s18   ;;  %s2258_s17 = sphi %s2300_s17, %s3007_s17   ;;  %s2254_s16 = sphi %s2298_s16, %s3006_s16   ;;  %s2250_s15 = sphi %s2296_s15, %s3005_s15  }
   0x7   : > { %p41_p0 = scmp.ne.s32.totalorder %s2254_s16, %s2250_s15  ;;  %p2989_p1 = scmp.eq.s32.totalorder %s2317_s19, 0 }
   0x8   : > { %p134_p3 = scmp.eq.s32.totalorder %s1450_s20, 1  ;;  %p1451_p5 = scmp.ge.s32.totalorder %s2262_s18, 1 }
   0x9   : > { %p2326_p4 = por %p2989_p1, %p41_p0  ;;  %p141_p7 = scmp.lt.s32.totalorder %s2262_s18, 3 }
   0xa   : > { %p2331_p6 = por %p134_p3, %p41_p0  ;;  %s2264_s24 = smov [#allocation5]  }
   0xb   : > { %s2992_s21 = scalar_select %p2326_p4, 1, 0 }
   0xc   : > { %s2993_s22 = scalar_select %p2331_p6, 1, 0 }
   0xd   : > { %p2336_p8 = pnand %p1451_p5, %p141_p7  ;;  %s153_s25 = sshll.u32 %s2264_s24, 4  ;;  %s2340_s25 = int_to_ptr.vmem [resolvable:$true] %s153_s25 }
   0xe   : > { %s2352_s27 = sadd.s32 1, %s2262_s18   ;;  %s28_s28 = sadd.s32 1, %s2258_s17 }
   0xf   : > { %s2994_s23 = scalar_select %p2336_p8, 1, 0 }
  0x10   : > { %p1857_p9 = pneg %p2336_p8  ;;  %s25_s29 = ssub.s32 %s2262_s18, %s2352_s27 }
  0x11   : > { %s2134_s6 = scalar_lea.hbm %s2985_s1, 1024 }
  0x12   : > { %p2347_p11 = pnand %p1857_p9, %p2989_p1  ;;  %p2135_p12 = scmp.ne.s32.totalorder %s2985_s1, %s2134_s6 }
  0x13   : > { %p2141_p5 = scmp.lt.u32.totalorder %s2134_s6, %s2985_s1 }
  0x14   : > { %p2136_p13 = pneg %p2347_p11 }
  0x16   : > { %p2137_p0 = pnand %p2136_p13, %p2135_p12 }
  0x18   : > { %p2138_p3 = pneg %p2137_p0 }
  0x1a   : > { %p2143_p7 = pnand %p2141_p5, %p2138_p3 }
  0x1c   : > { %2146 = shalt.err (!%p2143_p7)
}
  0x1d   : > { %s2147_s11 = scalar_lea.vmem %s2340_s25, 1024  ;;  %p2155_p2 = scmp.lt.s32.totalorder %s2340_s25, %s2340_s25 }
  0x1e   : > { %p2148_p9 = scmp.ne.s32.totalorder %s2340_s25, %s2147_s11  ;;  %p2156_p6 = scmp.lt.s32.totalorder %s2147_s11, %s2147_s11 }
  0x20   : > { %p2150_p10 = pnand %p2148_p9, %p2136_p13  ;;  %p2157_p4 = por %p2156_p6, %p2155_p2 }
  0x22   : > { %p2151_p1 = pneg %p2150_p10 }
  0x24   : > { %p2158_p8 = pnand %p2157_p4, %p2151_p1 }
  0x26   : > { %2161 = shalt.err (!%p2158_p8)
}
  0x27   : > { %s2265_s12 = smov 64   ;;  %s2266_s13 = smov 4  }
  0x28   : > { %1860 = dma.hbm_to_vmem [thread:$0]  (!%p2347_p11), %s2985_s1, 1024, %s2340_s25, [#allocation6], %s2265_s12, %s2265_s12, %s2266_s13  }
  0x29   : > { %p26_p1 = scmp.eq.s32.totalorder %s25_s29, 0  ;;  %p35_p2 = scmp.ne.s32.totalorder %s2258_s17, %s2254_s16 }
  0x2a   : > { %p36_p4 = scmp.eq.s32.totalorder %s2262_s18, 0  ;;  %p1870_p6 = scmp.lt.s32.totalorder %s2262_s18, 2 }
  0x2b   : > { %s2386_s24 = scalar_select %p26_p1, %s2258_s17, %s28_s28  }
  0x2c   : > { %p37_p8 = por %p36_p4, %p35_p2  ;;  %p2996_p10 = scmp.eq.s32.totalorder %s2317_s19, 1 }
  0x2d   : > { %s173_s26 = sand.u32 1, %s2258_s17   ;;  %s1542_s5 = smul.u32 3072, %s2262_s18 }
  0x2e   : > { %p2390_p12 = por %p2996_p10, %p35_p2  ;;  %s1847_s6 = smul.u32 192, %s173_s26 }
  0x2f   : > { %p2396_p13 = pnand %p1870_p6, %p37_p8  ;;  %s2403_s28 = scalar_lea.hbm %s2984_s0, %s1542_s5 }
  0x30   : > { %s177_s8 = scalar_lea.vmem [#allocation2], %s1847_s6  ;;  %s2407_s10 = scalar_lea.sflag [#allocation3], %s173_s26 }
  0x31   : > { %s184_s9 = sshll.u32 %s177_s8, 4  ;;  %s2162_s11 = scalar_lea.hbm %s2403_s28, 3072  ;;  %s2405_s9 = int_to_ptr.vmem [resolvable:$true] %s184_s9 }
  0x32   : > { %p2163_p11 = scmp.ne.s32.totalorder %s2403_s28, %s2162_s11  ;;  %p2164_p0 = pneg %p2396_p13 }
  0x33   : > { %s2167_s5 = scalar_lea.hbm %s2984_s0, 6144  ;;  %p2168_p7 = scmp.lt.u32.totalorder %s2403_s28, %s2984_s0 }
  0x34   : > { %p2165_p3 = pnand %p2164_p0, %p2163_p11  ;;  %p2169_p9 = scmp.lt.u32.totalorder %s2167_s5, %s2162_s11 }
  0x35   : > { %p2171_p2 = scmp.lt.u32.totalorder %s2162_s11, %s2403_s28 }
  0x36   : > { %p2166_p5 = pneg %p2165_p3  ;;  %p2170_p1 = por %p2169_p9, %p2168_p7 }
  0x38   : > { %p2172_p4 = por %p2171_p2, %p2170_p1 }
  0x3a   : > { %p2173_p6 = pnand %p2172_p4, %p2166_p5 }
  0x3c   : > { %2176 = shalt.err (!%p2173_p6)
}
  0x3d   : > { %s2177_s26 = scalar_lea.vmem %s2405_s9, 3072  ;;  %s2267_s6 = smov [#allocation2]  }
  0x3e   : > { %p2178_p8 = scmp.ne.s32.totalorder %s2405_s9, %s2177_s26  ;;  %s2182_s8 = sshll.u32 %s2267_s6, 4  ;;  %s2183_s8 = int_to_ptr.vmem [resolvable:$false] %s2182_s8 }
  0x3f   : > { %s2184_s14 = scalar_lea.vmem %s2183_s8, 6144  ;;  %p2185_p3 = scmp.lt.s32.totalorder %s2405_s9, %s2183_s8 }
  0x40   : > { %p2180_p10 = pnand %p2178_p8, %p2164_p0  ;;  %p2186_p7 = scmp.lt.s32.totalorder %s2184_s14, %s2177_s26 }
  0x42   : > { %p2181_p11 = pneg %p2180_p10  ;;  %p2187_p9 = por %p2186_p7, %p2185_p3 }
  0x44   : > { %p2188_p1 = pnand %p2187_p9, %p2181_p11 }
  0x46   : > { %2191 = shalt.err (!%p2188_p1)
}
  0x47   : > { %1864 = dma.hbm_to_vmem [thread:$0]  (!%p2396_p13), %s2403_s28, 3072, %s2405_s9, %s2407_s10, %s2265_s12, %s2265_s12, %s2266_s13  }
  0x48   : > { %p2999_p0 = scmp.ne.s32.totalorder %s2994_s23, 0 }
  0x49   : > { %s2441_s11 = sand.u32 (!%p2999_p0), 1, %s2254_s16   ;;  %p3000_p5 = scmp.ne.s32.totalorder (!%p2999_p0), %s2992_s21, 0 }
  0x4a   : > { %196 = sbr.rel (%p2999_p0) target bundleno = 471 (0x1d7), region = 36  ;;  %s199_s5 = scalar_lea.sflag (!%p2999_p0), [#allocation3], %s2441_s11 }
  0x4b   : > { %s1848_s20 = smul.u32 (!%p2999_p0), 192, %s2441_s11 }
  0x4d   : > { %s2447_s7 = scalar_lea.vmem (!%p2999_p0), [#allocation2], %s1848_s20 }
  0x51   : > { %2237 = dma.done.wait (%p3000_p5), %s199_s5, 3072  }
  0x52   : > { %2239 = vsyncadd (%p3000_p5), %s199_s5, 4294964224  ;;  %p3001_p13 = scmp.eq.s32.totalorder %s2317_s19, 0 }
  0x54   : > { %2241 = dma.done.wait (%p3001_p13), [#allocation6], 1024   ;;  %p3002_p2 = pmov %p3001_p13 }
  0x55   : > { %v1910_v0 = vld [vmem:[#allocation5] sm:$0xff]   ;;  %v1911_v1 = vld [vmem:[#allocation5 + $0x8] sm:$0xff]   ;;  %v1912_v2 = vld [vmem:[#allocation5 + $0x10] sm:$0xff]   ;;  %s2698_s28 = scalar_lea.vmem [#allocation7], %s1848_s20  ;;  %s1591_s9 = smul.u32 3072, %s2317_s19 }
  0x56   : > { %2243 = vsyncadd (%p3002_p2), [#allocation6], 4294966272  ;;  %1767 = vmatprep.subr.bf16.mxu0 %v1910_v0  ;;  %1831 = vmatprep.subr.bf16.mxu1 %v1910_v0  ;;  %v1913_v3 = vld [vmem:[#allocation5 + $0x18] sm:$0xff]   ;;  %v1918_v4 = vld [vmem:[%s2447_s7] sm:$0xff]   ;;  %s1367_s10 = sshll.u32 %s2698_s28, 4  ;;  %s1354_s26 = scalar_lea.sflag [#allocation4], %s2441_s11  ;;  %s2938_s10 = int_to_ptr.vmem [resolvable:$true] %s1367_s10 }
  0x57   : > { %1768 = vmatpush3.bf16.msra.mxu0 %v1910_v0  ;;  %1839 = vmatpush3.bf16.msra.mxu1 %v1910_v0  ;;  %v1919_v5 = vld [vmem:[%s2447_s7 + $0x60] sm:$0xff]   ;;  %v1915_v7 = vld [vmem:[#allocation5 + $0x28] sm:$0xff]   ;;  %v1916_v8 = vld [vmem:[#allocation5 + $0x30] sm:$0xff]   ;;  %s2936_s29 = scalar_lea.hbm %s2988_s4, %s1591_s9  ;;  %s2192_s6 = scalar_lea.vmem %s2938_s10, 3072 }
  0x58   : > { %1769 = vmatprep.subr.bf16.mxu0 %v1911_v1  ;;  %1832 = vmatprep.subr.bf16.mxu1 %v1911_v1  ;;  %v1914_v6 = vld [vmem:[#allocation5 + $0x20] sm:$0xff]   ;;  %v1917_v9 = vld [vmem:[#allocation5 + $0x38] sm:$0xff]   ;;  %v1920_v10 = vld [vmem:[%s2447_s7 + $0x8] sm:$0xff]   ;;  %p2193_p4 = scmp.ne.s32.totalorder %s2938_s10, %s2192_s6  ;;  %s2268_s8 = smov [#allocation7]  }
  0x59   : > { %1783 = vmatprep.mubr.bf16.mxu0 %v1918_v4  ;;  %1807 = vmatprep.mubr.bf16.mxu1 %v1919_v5  ;;  %v1921_v11 = vld [vmem:[%s2447_s7 + $0x68] sm:$0xff]   ;;  %v1922_v12 = vld [vmem:[%s2447_s7 + $0x10] sm:$0xff]   ;;  %v1924_v14 = vld [vmem:[%s2447_s7 + $0x18] sm:$0xff]   ;;  %s2196_s14 = sshll.u32 %s2268_s8, 4  ;;  %s2197_s14 = int_to_ptr.vmem [resolvable:$false] %s2196_s14 }
  0x5a   : > { %v1923_v13 = vld [vmem:[%s2447_s7 + $0x70] sm:$0xff]   ;;  %v1925_v15 = vld [vmem:[%s2447_s7 + $0x78] sm:$0xff]   ;;  %v1926_v16 = vld [vmem:[%s2447_s7 + $0x20] sm:$0xff]   ;;  %p2194_p6 = pnand %p2193_p4, %p2390_p12  ;;  %s2198_s20 = scalar_lea.vmem %s2197_s14, 6144 }
  0x5b   : > { %1770 = vmatpush3.bf16.msra.mxu0 %v1911_v1  ;;  %1840 = vmatpush3.bf16.msra.mxu1 %v1911_v1  ;;  %v1927_v17 = vld [vmem:[%s2447_s7 + $0x80] sm:$0xff]   ;;  %v1928_v18 = vld [vmem:[%s2447_s7 + $0x28] sm:$0xff]   ;;  %v1930_v20 = vld [vmem:[%s2447_s7 + $0x30] sm:$0xff]   ;;  %p2199_p10 = scmp.lt.s32.totalorder %s2938_s10, %s2197_s14  ;;  %p2200_p11 = scmp.lt.s32.totalorder %s2198_s20, %s2192_s6 }
  0x5c   : > { %1771 = vmatprep.subr.bf16.mxu0 %v1912_v2  ;;  %1833 = vmatprep.subr.bf16.mxu1 %v1912_v2  ;;  %v1929_v19 = vld [vmem:[%s2447_s7 + $0x88] sm:$0xff]   ;;  %v1931_v21 = vld [vmem:[%s2447_s7 + $0x90] sm:$0xff]   ;;  %v1932_v22 = vld [vmem:[%s2447_s7 + $0x38] sm:$0xff]   ;;  %p2195_p8 = pneg %p2194_p6 }
  0x5d   : > { %v1933_v23 = vld [vmem:[%s2447_s7 + $0x98] sm:$0xff]   ;;  %v1934_v24 = vld [vmem:[%s2447_s7 + $0x40] sm:$0xff]   ;;  %v1936_v26 = vld [vmem:[%s2447_s7 + $0x48] sm:$0xff]   ;;  %p2201_p3 = por %p2200_p11, %p2199_p10 }
  0x5e   : > { %v1935_v25 = vld [vmem:[%s2447_s7 + $0xa0] sm:$0xff]   ;;  %v1937_v27 = vld [vmem:[%s2447_s7 + $0xa8] sm:$0xff]   ;;  %v1938_v28 = vld [vmem:[%s2447_s7 + $0x50] sm:$0xff]  }
  0x5f   : > { %1772 = vmatpush3.bf16.msra.mxu0 %v1912_v2  ;;  %1841 = vmatpush3.bf16.msra.mxu1 %v1912_v2  ;;  %v1939_v29 = vld [vmem:[%s2447_s7 + $0xb0] sm:$0xff]   ;;  %v1940_v30 = vld [vmem:[%s2447_s7 + $0x58] sm:$0xff]   ;;  %v2484_v32 = vld [vmem:[%s2986_s2] ss:$0 sm:$0xff]  ;;  %p2202_p7 = pnand %p2201_p3, %p2195_p8 }
  0x60   : > { %1773 = vmatprep.subr.bf16.mxu0 %v1913_v3  ;;  %1834 = vmatprep.subr.bf16.mxu1 %v1913_v3  ;;  %v1941_v31 = vld [vmem:[%s2447_s7 + $0xb8] sm:$0xff]   ;;  %v2489_v34 = vld [vmem:[%s2987_s3] ss:$0 sm:$0xff] }
  0x63   : > { %1774 = vmatpush3.bf16.msra.mxu0 %v1913_v3  ;;  %1842 = vmatpush3.bf16.msra.mxu1 %v1913_v3 }
  0x64   : > { %1775 = vmatprep.subr.bf16.mxu0 %v1914_v6  ;;  %1835 = vmatprep.subr.bf16.mxu1 %v1914_v6 }
  0x67   : > { %1776 = vmatpush3.bf16.msra.mxu0 %v1914_v6  ;;  %1843 = vmatpush3.bf16.msra.mxu1 %v1914_v6 }
  0x68   : > { %1777 = vmatprep.subr.bf16.mxu0 %v1915_v7  ;;  %1836 = vmatprep.subr.bf16.mxu1 %v1915_v7 }
  0x6b   : > { %1778 = vmatpush3.bf16.msra.mxu0 %v1915_v7  ;;  %1844 = vmatpush3.bf16.msra.mxu1 %v1915_v7 }
  0x6c   : > { %1779 = vmatprep.subr.bf16.mxu0 %v1916_v8  ;;  %1837 = vmatprep.subr.bf16.mxu1 %v1916_v8 }
  0x6f   : > { %1780 = vmatpush3.bf16.msra.mxu0 %v1916_v8  ;;  %1845 = vmatpush3.bf16.msra.mxu1 %v1916_v8 }
  0x70   : > { %1781 = vmatprep.subr.bf16.mxu0 %v1917_v9  ;;  %1838 = vmatprep.subr.bf16.mxu1 %v1917_v9 }
  0x73   : > { %1782 = vmatpush3.bf16.msra.mxu0 %v1917_v9  ;;  %1846 = vmatpush3.bf16.msra.mxu1 %v1917_v9 }
  0x76   : > { %1784 = vmatmul.mubr.bf16.vlgmr.msra.gmra.mrb[0].mxu0 %v1920_v10  ;;  %1808 = vmatmul.mubr.bf16.vlgmr.msra.gmra.mrb[0].mxu1 %v1921_v11 }
  0x77   : > { %1787 = vmatprep.mubr.bf16.mxu0 %v1922_v12  ;;  %1811 = vmatprep.mubr.bf16.mxu1 %v1923_v13 }
  0x7e   : > { %1788 = vmatmul.mubr.bf16.gmra.mrb[4].mxu0 %v1924_v14  ;;  %1812 = vmatmul.mubr.bf16.gmra.mrb[4].mxu1 %v1925_v15 }
  0x7f   : > { %1791 = vmatprep.mubr.bf16.mxu0 %v1926_v16  ;;  %1815 = vmatprep.mubr.bf16.mxu1 %v1927_v17 }
  0x86   : > { %1792 = vmatmul.mubr.bf16.gmra.mrb[8].mxu0 %v1928_v18  ;;  %1816 = vmatmul.mubr.bf16.gmra.mrb[8].mxu1 %v1929_v19 }
  0x87   : > { %1795 = vmatprep.mubr.bf16.mxu0 %v1930_v20  ;;  %1819 = vmatprep.mubr.bf16.mxu1 %v1931_v21 }
  0x8e   : > { %1796 = vmatmul.mubr.bf16.gmra.mrb[12].mxu0 %v1932_v22  ;;  %1820 = vmatmul.mubr.bf16.gmra.mrb[12].mxu1 %v1933_v23 }
  0x8f   : > { %1799 = vmatprep.mubr.bf16.mxu0 %v1934_v24  ;;  %1823 = vmatprep.mubr.bf16.mxu1 %v1935_v25 }
  0x96   : > { %1800 = vmatmul.mubr.bf16.gmra.mrb[16].mxu0 %v1936_v26  ;;  %1824 = vmatmul.mubr.bf16.gmra.mrb[16].mxu1 %v1937_v27 }
  0x97   : > { %1803 = vmatprep.mubr.bf16.mxu0 %v1938_v28  ;;  %1827 = vmatprep.mubr.bf16.mxu1 %v1939_v29 }
  0x9e   : > { %1804 = vmatmul.mubr.bf16.gmra.mrb[20].mxu0 %v1940_v30  ;;  %1828 = vmatmul.mubr.bf16.gmra.mrb[20].mxu1 %v1941_v31 }
 0x149   : > { %v1785_v33 = vpop.f32.mrb[0].mxu0  ;;  %v1809_v35 = vpop.f32.mrb[0].mxu1 }
 0x14a   : > { %v724_v36 = vmul.f32 %v1785_v33, %v2484_v32  ;;  %v748_v37 = vmul.f32 %v1809_v35, %v2484_v32  ;;  %v524_v38 = vpop.f32.mrb[1].mxu0  ;;  %v620_v39 = vpop.f32.mrb[1].mxu1 }
 0x14b   : > { %v722_v40 = vmul.f32 %v2484_v32, %v524_v38  ;;  %v746_v41 = vmul.f32 %v2484_v32, %v620_v39  ;;  %v1786_v42 = vpop.f32.mrb[2].mxu0  ;;  %v1810_v43 = vpop.f32.mrb[2].mxu1 }
 0x14c   : > { %v2496_v44 = vadd.f32 %v2489_v34, %v724_v36  ;;  %v2499_v45 = vadd.f32 %v2489_v34, %v748_v37  ;;  %v725_v46 = vmul.f32 %v1786_v42, %v2484_v32  ;;  %v749_v47 = vmul.f32 %v1810_v43, %v2484_v32  ;;  %v527_v48 = vpop.f32.mrb[3].mxu0  ;;  %v623_v49 = vpop.f32.mrb[3].mxu1 }
 0x14d   : > { %v2504_v50 = vadd.f32 %v2489_v34, %v722_v40  ;;  %v2507_v51 = vadd.f32 %v2489_v34, %v746_v41  ;;  %v723_v52 = vmul.f32 %v2484_v32, %v527_v48  ;;  %v747_v53 = vmul.f32 %v2484_v32, %v623_v49 }
 0x14e   : > { %v827_v54 = vsub.f32 0.0, %v2496_v44  ;;  %v851_v55 = vsub.f32 0.0, %v2499_v45  ;;  %v2514_v56 = vadd.f32 %v2489_v34, %v725_v46  ;;  %v2517_v57 = vadd.f32 %v2489_v34, %v749_v47 }
 0x14f   : > { %v825_v58 = vsub.f32 0.0, %v2504_v50  ;;  %v849_v59 = vsub.f32 0.0, %v2507_v51  ;;  %v2522_v60 = vadd.f32 %v2489_v34, %v723_v52  ;;  %v2525_v61 = vadd.f32 %v2489_v34, %v747_v53 }
 0x150   : > { %v877_v62 = vmul.f32 1.442695, %v827_v54  ;;  %v925_v63 = vmul.f32 1.442695, %v851_v55  ;;  %v828_v0 = vsub.f32 0.0, %v2514_v56  ;;  %v852_v1 = vsub.f32 0.0, %v2517_v57 }
 0x151   : > { %v873_v2 = vmul.f32 1.442695, %v825_v58  ;;  %v921_v3 = vmul.f32 1.442695, %v849_v59  ;;  %v826_v4 = vsub.f32 0.0, %v2522_v60  ;;  %v850_v5 = vsub.f32 0.0, %v2525_v61 }
 0x152   : > { %1942 = vpow2.f32 %v877_v62  ;;  %v879_v6 = vmul.f32 1.442695, %v828_v0  ;;  %v927_v7 = vmul.f32 1.442695, %v852_v1  ;;  %v1789_v8 = vpop.f32.mrb[4].mxu0  ;;  %v1813_v9 = vpop.f32.mrb[4].mxu1 }
 0x153   : > { %1944 = vpow2.f32 %v925_v63  ;;  %v875_v10 = vmul.f32 1.442695, %v826_v4  ;;  %v923_v11 = vmul.f32 1.442695, %v850_v5  ;;  %v728_v12 = vmul.f32 %v1789_v8, %v2484_v32  ;;  %v540_v13 = vpop.f32.mrb[5].mxu0  ;;  %v636_v14 = vpop.f32.mrb[5].mxu1 }
 0x154   : > { %1946 = vpow2.f32 %v873_v2  ;;  %v752_v15 = vmul.f32 %v1813_v9, %v2484_v32  ;;  %v726_v16 = vmul.f32 %v2484_v32, %v540_v13  ;;  %v750_v17 = vmul.f32 %v2484_v32, %v636_v14  ;;  %v1790_v18 = vpop.f32.mrb[6].mxu0  ;;  %v1814_v19 = vpop.f32.mrb[6].mxu1 }
 0x155   : > { %1948 = vpow2.f32 %v921_v3  ;;  %v2536_v20 = vadd.f32 %v2489_v34, %v728_v12  ;;  %v729_v21 = vmul.f32 %v1790_v18, %v2484_v32  ;;  %v753_v22 = vmul.f32 %v1814_v19, %v2484_v32  ;;  %v543_v23 = vpop.f32.mrb[7].mxu0  ;;  %v639_v24 = vpop.f32.mrb[7].mxu1 }
 0x156   : > { %1950 = vpow2.f32 %v879_v6  ;;  %v2541_v25 = vadd.f32 %v2489_v34, %v752_v15  ;;  %v2544_v26 = vadd.f32 %v2489_v34, %v726_v16  ;;  %v2547_v27 = vadd.f32 %v2489_v34, %v750_v17 }
 0x157   : > { %1952 = vpow2.f32 %v927_v7  ;;  %v831_v28 = vsub.f32 0.0, %v2536_v20  ;;  %v2551_v29 = vadd.f32 %v2489_v34, %v729_v21  ;;  %v2554_v30 = vadd.f32 %v2489_v34, %v753_v22 }
 0x158   : > { %1954 = vpow2.f32 %v875_v10  ;;  %v855_v31 = vsub.f32 0.0, %v2541_v25  ;;  %v829_v33 = vsub.f32 0.0, %v2544_v26  ;;  %v853_v35 = vsub.f32 0.0, %v2547_v27 }
 0x159   : > { %1956 = vpow2.f32 %v923_v11  ;;  %v885_v36 = vmul.f32 1.442695, %v831_v28  ;;  %v832_v37 = vsub.f32 0.0, %v2551_v29  ;;  %v856_v38 = vsub.f32 0.0, %v2554_v30  ;;  %v1793_v39 = vpop.f32.mrb[8].mxu0  ;;  %v1817_v40 = vpop.f32.mrb[8].mxu1 }
 0x15a   : > { %v933_v41 = vmul.f32 1.442695, %v855_v31  ;;  %v881_v42 = vmul.f32 1.442695, %v829_v33  ;;  %v929_v43 = vmul.f32 1.442695, %v853_v35  ;;  %v727_v46 = vmul.f32 %v2484_v32, %v543_v23 }
 0x15b   : > { %1958 = vpow2.f32 %v885_v36  ;;  %v2562_v47 = vmul.f32 1.442695, %v832_v37  ;;  %v2564_v48 = vmul.f32 1.442695, %v856_v38  ;;  %v751_v49 = vmul.f32 %v2484_v32, %v639_v24  ;;  %v556_v52 = vpop.f32.mrb[9].mxu0  ;;  %v652_v53 = vpop.f32.mrb[9].mxu1 }
 0x15c   : > { %v1943_v54 = vpop.eup %1942  ;;  %1960 = vpow2.f32 %v933_v41  ;;  %v2568_v55 = vadd.f32 %v2489_v34, %v727_v46  ;;  %v732_v58 = vmul.f32 %v1793_v39, %v2484_v32  ;;  %v756_v59 = vmul.f32 %v1817_v40, %v2484_v32  ;;  %v1794_v62 = vpop.f32.mrb[10].mxu0 }
 0x15d   : > { %v1818_v63 = vpop.f32.mrb[10].mxu1  ;;  %v1945_v0 = vpop.eup %1944  ;;  %v971_v1 = vadd.f32 1.0, %v1943_v54  ;;  %1962 = vpow2.f32 %v881_v42  ;;  %v2573_v2 = vadd.f32 %v2489_v34, %v751_v49  ;;  %v730_v3 = vmul.f32 %v2484_v32, %v556_v52 }
 0x15e   : > { %v559_v4 = vpop.f32.mrb[11].mxu0  ;;  %v2576_v5 = vpop.f32.mrb[11].mxu1  ;;  %v995_v7 = vadd.f32 1.0, %v1945_v0  ;;  %1964 = vpow2.f32 %v929_v43  ;;  %v830_v8 = vsub.f32 0.0, %v2568_v55  ;;  %v2580_v9 = vadd.f32 %v2489_v34, %v732_v58 }
 0x15f   : > { %v1947_v6 = vpop.eup %1946  ;;  %1966 = vrcp.f32 %v971_v1  ;;  %v854_v12 = vsub.f32 0.0, %v2573_v2  ;;  %v2584_v13 = vadd.f32 %v2489_v34, %v756_v59  ;;  %v2599_v35 = vadd.f32 %v2489_v34, %v730_v3 }
 0x160   : > { %v1949_v10 = vpop.eup %1948  ;;  %v969_v11 = vadd.f32 1.0, %v1947_v6  ;;  %1968 = vrcp.f32 %v995_v7  ;;  %v2586_v16 = vmul.f32 1.442695, %v830_v8  ;;  %v835_v17 = vsub.f32 0.0, %v2580_v9 }
 0x161   : > { %v1951_v14 = vpop.eup %1950  ;;  %v993_v15 = vadd.f32 1.0, %v1949_v10  ;;  %v2589_v21 = vmul.f32 1.442695, %v854_v12  ;;  %v859_v22 = vsub.f32 0.0, %v2584_v13  ;;  %v2592_v23 = vpop.f32.mrb[12].mxu0  ;;  %v754_v41 = vmul.f32 %v2484_v32, %v652_v53 }
 0x162   : > { %v1953_v18 = vpop.eup %1952  ;;  %1970 = vrcp.f32 %v969_v11  ;;  %v972_v19 = vadd.f32 1.0, %v1951_v14  ;;  %v2594_v24 = vpop.f32.mrb[12].mxu1  ;;  %v2596_v33 = vmul.f32 1.442695, %v835_v17  ;;  %v833_v49 = vsub.f32 0.0, %v2599_v35 }
 0x163   : > { %v1955_v28 = vpop.eup %1954  ;;  %1972 = vrcp.f32 %v993_v15  ;;  %v996_v31 = vadd.f32 1.0, %v1953_v18  ;;  %v2601_v36 = vpop.f32.mrb[13].mxu0  ;;  %v2605_v40 = vmul.f32 1.442695, %v859_v22  ;;  %v733_v52 = vmul.f32 %v1794_v62, %v2484_v32 }
 0x164   : > { %v2603_v37 = vpop.f32.mrb[13].mxu1  ;;  %v1957_v38 = vpop.eup %1956  ;;  %1974 = vrcp.f32 %v972_v19  ;;  %v970_v39 = vadd.f32 1.0, %v1955_v28  ;;  %v2619_v0 = vadd.f32 %v2489_v34, %v754_v41  ;;  %v757_v53 = vmul.f32 %v1818_v63, %v2484_v32 }
 0x165   : > { %v2608_v42 = vpop.f32.mrb[14].mxu0  ;;  %v2610_v43 = vpop.f32.mrb[14].mxu1  ;;  %1976 = vrcp.f32 %v996_v31  ;;  %v994_v46 = vadd.f32 1.0, %v1957_v38  ;;  %v731_v1 = vmul.f32 %v2484_v32, %v559_v4  ;;  %v2623_v7 = vmul.f32 1.442695, %v833_v49 }
 0x166   : > { %v2614_v54 = vpop.f32.mrb[15].mxu0  ;;  %v2616_v58 = vpop.f32.mrb[15].mxu1  ;;  %1978 = vrcp.f32 %v970_v39  ;;  %v2626_v62 = vadd.f32 %v2489_v34, %v733_v52  ;;  %v857_v11 = vsub.f32 0.0, %v2619_v0  ;;  %v2631_v12 = vadd.f32 %v2489_v34, %v757_v53 }
 0x167   : > { %v1959_v59 = vpop.eup %1958  ;;  %1980 = vrcp.f32 %v994_v46  ;;  %v2635_v15 = vadd.f32 %v2489_v34, %v731_v1  ;;  %v755_v1 = vmul.f32 %v2484_v32, %v2576_v5 }
 0x168   : > { %v1961_v3 = vpop.eup %1960  ;;  %v975_v6 = vadd.f32 1.0, %v1959_v59  ;;  %1982 = vpow2.f32 %v2562_v47  ;;  %v836_v14 = vsub.f32 0.0, %v2626_v62  ;;  %v937_v19 = vmul.f32 1.442695, %v857_v11 }
 0x169   : > { %v1963_v8 = vpop.eup %1962  ;;  %v999_v10 = vadd.f32 1.0, %v1961_v3  ;;  %v860_v22 = vsub.f32 0.0, %v2631_v12  ;;  %v2638_v47 = vpop.f32.mrb[16].mxu0  ;;  %v834_v41 = vsub.f32 0.0, %v2635_v15 }
 0x16a   : > { %v1965_v63 = vpop.eup %1964  ;;  %1984 = vrcp.f32 %v975_v6  ;;  %v973_v4 = vadd.f32 1.0, %v1963_v8  ;;  %v2640_v28 = vpop.f32.mrb[16].mxu1  ;;  %v895_v39 = vmul.f32 1.442695, %v836_v14  ;;  %v2670_v14 = vadd.f32 %v2489_v34, %v755_v1 }
 0x16b   : > { %v1967_v17 = vpop.eup %1966  ;;  %1986 = vrcp.f32 %v999_v10  ;;  %v997_v18 = vadd.f32 1.0, %v1965_v63  ;;  %v2644_v46 = vpop.f32.mrb[17].mxu0  ;;  %v2649_v53 = vmul.f32 1.442695, %v860_v22  ;;  %v2659_v10 = vmul.f32 1.442695, %v834_v41 }
 0x16c   : > { %v1969_v31 = vpop.eup %1968  ;;  %v1067_v38 = vmul.f32 %v1967_v17, %v2496_v44  ;;  %1988 = vrcp.f32 %v973_v4  ;;  %v2646_v49 = vpop.f32.mrb[17].mxu1  ;;  %v858_v22 = vsub.f32 0.0, %v2670_v14 }
 0x16d   : > { %v1971_v52 = vpop.eup %1970  ;;  %v1091_v59 = vmul.f32 %v1969_v31, %v2499_v45  ;;  %1990 = vrcp.f32 %v997_v18  ;;  %v2653_v3 = vpop.f32.mrb[18].mxu0  ;;  %v736_v45 = vmul.f32 %v2592_v23, %v2484_v32  ;;  %v734_v18 = vmul.f32 %v2484_v32, %v2601_v36 }
 0x16e   : > { %v2655_v44 = vpop.f32.mrb[18].mxu1  ;;  %v1973_v6 = vpop.eup %1972  ;;  %v1065_v8 = vmul.f32 %v1971_v52, %v2504_v50  ;;  %1992 = vpow2.f32 %v2564_v48  ;;  %v760_v50 = vmul.f32 %v2594_v24, %v2484_v32 }
 0x16f   : > { %v2663_v11 = vpop.f32.mrb[19].mxu0  ;;  %v2665_v63 = vpop.f32.mrb[19].mxu1  ;;  %v1089_v5 = vmul.f32 %v1973_v6, %v2507_v51  ;;  %1994 = vpow2.f32 %v2586_v16  ;;  %v2677_v23 = vadd.f32 %v2489_v34, %v736_v45 }
 0x170   : > { %v1975_v4 = vpop.eup %1974  ;;  %1996 = vpow2.f32 %v2589_v21  ;;  %v2685_v24 = vadd.f32 %v2489_v34, %v760_v50 }
 0x171   : > { %v1977_v48 = vpop.eup %1976  ;;  %v1068_v17 = vmul.f32 %v1975_v4, %v2514_v56  ;;  %1998 = vpow2.f32 %v2596_v33  ;;  %v839_v41 = vsub.f32 0.0, %v2677_v23  ;;  %v939_v33 = vmul.f32 1.442695, %v858_v22  ;;  %v2692_v1 = vpop.f32.mrb[20].mxu0 }
 0x172   : > { %v1979_v51 = vpop.eup %1978  ;;  %v1092_v16 = vmul.f32 %v1977_v48, %v2517_v57  ;;  %2000 = vpow2.f32 %v2605_v40  ;;  %v2694_v6 = vpop.f32.mrb[20].mxu1  ;;  %v863_v48 = vsub.f32 0.0, %v2685_v24 }
 0x173   : > { %v1981_v56 = vpop.eup %1980  ;;  %v1600_v31 = vpack.c.bf16 %v1068_v17, %v1067_v38  ;;  %v1066_v21 = vmul.f32 %v1979_v51, %v2522_v60  ;;  %2002 = vpow2.f32 %v2623_v7  ;;  %v901_v38 = vmul.f32 1.442695, %v839_v41  ;;  %v2703_v7 = vpop.f32.mrb[21].mxu1 }
 0x174   : > { %v1983_v36 = vpop.eup %1982  ;;  %v1660_v52 = vpack.c.bf16 %v1092_v16, %v1091_v59  ;;  %v1090_v57 = vmul.f32 %v1981_v56, %v2525_v61  ;;  %2004 = vpow2.f32 %v937_v19  ;;  %v2701_v61 = vpop.f32.mrb[21].mxu0  ;;  %v2719_v16 = vadd.f32 %v2489_v34, %v734_v18 }
 0x175   : > { %v1985_v45 = vpop.eup %1984  ;;  %1712 = vst [vmem:[%s2698_s28 + $0x8] sm:$0xff] %v1600_v31   ;;  %v1595_v60 = vpack.c.bf16 %v1066_v21, %v1065_v8  ;;  %v976_v40 = vadd.f32 1.0, %v1983_v36  ;;  %2006 = vpow2.f32 %v895_v39  ;;  %v2710_v17 = vpop.f32.mrb[22].mxu0  ;;  %v737_v31 = vmul.f32 %v2608_v42, %v2484_v32 }
 0x176   : > { %v1987_v59 = vpop.eup %1986  ;;  %1724 = vst [vmem:[%s2698_s28 + $0x68] sm:$0xff] %v1660_v52   ;;  %v1655_v4 = vpack.c.bf16 %v1090_v57, %v1089_v5  ;;  %v2707_v50 = vmul.f32 %v1985_v45, %v2536_v20  ;;  %v2712_v8 = vpop.f32.mrb[22].mxu1  ;;  %v758_v20 = vmul.f32 %v2484_v32, %v2603_v37  ;;  %v837_v37 = vsub.f32 0.0, %v2719_v16 }
 0x177   : > { %v1989_v19 = vpop.eup %1988  ;;  %1596 = vst [vmem:[%s2698_s28] sm:$0xff] %v1595_v60   ;;  %v2716_v51 = vmul.f32 %v1987_v59, %v2541_v25  ;;  %2008 = vrcp.f32 %v976_v40  ;;  %v2723_v5 = vpop.f32.mrb[23].mxu0  ;;  %v949_v25 = vmul.f32 1.442695, %v863_v48  ;;  %v761_v42 = vmul.f32 %v2610_v43, %v2484_v32 }
 0x178   : > { %v2725_v39 = vpop.f32.mrb[23].mxu1  ;;  %v1991_v22 = vpop.eup %1990  ;;  %1723 = vst [vmem:[%s2698_s28 + $0x60] sm:$0xff] %v1655_v4   ;;  %v2729_v56 = vmul.f32 %v1989_v19, %v2544_v26  ;;  %2010 = vpow2.f32 %v2649_v53  ;;  %v2740_v41 = vadd.f32 %v2489_v34, %v758_v20  ;;  %v2743_v53 = vadd.f32 %v2489_v34, %v737_v31 }
 0x179   : > { %v1993_v18 = vpop.eup %1992  ;;  %v2735_v21 = vmul.f32 %v1991_v22, %v2547_v27  ;;  %2012 = vpow2.f32 %v2659_v10  ;;  %v2747_v27 = vmul.f32 1.442695, %v837_v37  ;;  %v735_v43 = vmul.f32 %v2484_v32, %v2614_v54 }
 0x17a   : > { %v1995_v36 = vpop.eup %1994  ;;  %v1000_v26 = vadd.f32 1.0, %v1993_v18  ;;  %2014 = vpow2.f32 %v939_v33  ;;  %v861_v10 = vsub.f32 0.0, %v2740_v41  ;;  %v840_v40 = vsub.f32 0.0, %v2743_v53 }
 0x17b   : > { %v1997_v52 = vpop.eup %1996  ;;  %v974_v57 = vadd.f32 1.0, %v1995_v36  ;;  %2016 = vpow2.f32 %v901_v38  ;;  %v2752_v33 = vadd.f32 %v2489_v34, %v761_v42  ;;  %v2762_v37 = vadd.f32 %v2489_v34, %v735_v43 }
 0x17c   : > { %v1999_v45 = vpop.eup %1998  ;;  %2018 = vrcp.f32 %v1000_v26  ;;  %v998_v60 = vadd.f32 1.0, %v1997_v52  ;;  %v2754_v48 = vmul.f32 1.442695, %v861_v10  ;;  %v2758_v20 = vmul.f32 1.442695, %v840_v40 }
 0x17d   : > { %v2001_v59 = vpop.eup %2000  ;;  %2020 = vrcp.f32 %v974_v57  ;;  %v979_v4 = vadd.f32 1.0, %v1999_v45  ;;  %v864_v22 = vsub.f32 0.0, %v2752_v33  ;;  %v759_v36 = vmul.f32 %v2484_v32, %v2616_v58 }
 0x17e   : > { %v2003_v38 = vpop.eup %2002  ;;  %2022 = vrcp.f32 %v998_v60  ;;  %v1003_v19 = vadd.f32 1.0, %v2001_v59  ;;  %v740_v52 = vmul.f32 %v2638_v47, %v2484_v32  ;;  %v838_v45 = vsub.f32 0.0, %v2762_v37 }
 0x17f   : > { %v2005_v31 = vpop.eup %2004  ;;  %2024 = vrcp.f32 %v979_v4  ;;  %v977_v18 = vadd.f32 1.0, %v2003_v38  ;;  %v951_v54 = vmul.f32 1.442695, %v864_v22  ;;  %v2770_v60 = vadd.f32 %v2489_v34, %v759_v36 }
 0x180   : > { %v2007_v26 = vpop.eup %2006  ;;  %2026 = vrcp.f32 %v1003_v19  ;;  %v1001_v42 = vadd.f32 1.0, %v2005_v31  ;;  %v2774_v58 = vadd.f32 %v2489_v34, %v740_v52  ;;  %v764_v4 = vmul.f32 %v2640_v28, %v2484_v32 }
 0x181   : > { %v2009_v57 = vpop.eup %2008  ;;  %2028 = vrcp.f32 %v977_v18  ;;  %v980_v10 = vadd.f32 1.0, %v2007_v26  ;;  %v899_v38 = vmul.f32 1.442695, %v838_v45  ;;  %v862_v19 = vsub.f32 0.0, %v2770_v60 }
 0x182   : > { %v2011_v40 = vpop.eup %2010  ;;  %v1072_v59 = vmul.f32 %v2009_v57, %v2551_v29  ;;  %2030 = vrcp.f32 %v1001_v42  ;;  %v843_v29 = vsub.f32 0.0, %v2774_v58  ;;  %v2782_v28 = vadd.f32 %v2489_v34, %v764_v4 }
 0x183   : > { %v2013_v43 = vpop.eup %2012  ;;  %2032 = vrcp.f32 %v980_v10  ;;  %v1004_v47 = vadd.f32 1.0, %v2011_v40  ;;  %v947_v42 = vmul.f32 1.442695, %v862_v19  ;;  %v738_v45 = vmul.f32 %v2484_v32, %v2644_v46 }
 0x184   : > { %v2015_v22 = vpop.eup %2014  ;;  %v1610_v31 = vpack.c.bf16 %v1072_v59, %v2707_v50  ;;  %v978_v18 = vadd.f32 1.0, %v2013_v43  ;;  %2034 = vpow2.f32 %v949_v25  ;;  %v909_v10 = vmul.f32 1.442695, %v843_v29 }
 0x185   : > { %v2017_v36 = vpop.eup %2016  ;;  %2036 = vrcp.f32 %v1004_v47  ;;  %v1002_v26 = vadd.f32 1.0, %v2015_v22  ;;  %v867_v40 = vsub.f32 0.0, %v2782_v28  ;;  %v762_v59 = vmul.f32 %v2484_v32, %v2646_v49 }
 0x186   : > { %v2019_v52 = vpop.eup %2018  ;;  %1714 = vst [vmem:[%s2698_s28 + $0x18] sm:$0xff] %v1610_v31   ;;  %2038 = vrcp.f32 %v978_v18  ;;  %v983_v57 = vadd.f32 1.0, %v2017_v36  ;;  %v2793_v47 = vadd.f32 %v2489_v34, %v738_v45  ;;  %v741_v46 = vmul.f32 %v2653_v3, %v2484_v32 }
 0x187   : > { %v2021_v50 = vpop.eup %2020  ;;  %v1096_v25 = vmul.f32 %v2019_v52, %v2554_v30  ;;  %2040 = vrcp.f32 %v1002_v26  ;;  %v957_v49 = vmul.f32 1.442695, %v867_v40 }
 0x188   : > { %v2023_v43 = vpop.eup %2022  ;;  %v1070_v4 = vmul.f32 %v2021_v50, %v2568_v55  ;;  %2042 = vrcp.f32 %v983_v57  ;;  %v841_v29 = vsub.f32 0.0, %v2793_v47 }
 0x189   : > { %v2025_v19 = vpop.eup %2024  ;;  %v1670_v30 = vpack.c.bf16 %v1096_v25, %v2716_v51  ;;  %v1094_v22 = vmul.f32 %v2023_v43, %v2573_v2  ;;  %2044 = vpow2.f32 %v2747_v27  ;;  %v2809_v2 = vadd.f32 %v2489_v34, %v762_v59 }
 0x18a   : > { %v2027_v31 = vpop.eup %2026  ;;  %v1605_v18 = vpack.c.bf16 %v1070_v4, %v2729_v56  ;;  %v1075_v55 = vmul.f32 %v2025_v19, %v2580_v9  ;;  %2046 = vpow2.f32 %v2754_v48  ;;  %v905_v56 = vmul.f32 1.442695, %v841_v29 }
 0x18b   : > { %v2029_v3 = vpop.eup %2028  ;;  %1726 = vst [vmem:[%s2698_s28 + $0x78] sm:$0xff] %v1670_v30   ;;  %v1665_v51 = vpack.c.bf16 %v1094_v22, %v2735_v21  ;;  %v1099_v36 = vmul.f32 %v2027_v31, %v2584_v13  ;;  %2048 = vpow2.f32 %v2758_v20  ;;  %v2814_v48 = vadd.f32 %v2489_v34, %v741_v46 }
 0x18c   : > { %v2031_v27 = vpop.eup %2030  ;;  %1713 = vst [vmem:[%s2698_s28 + $0x10] sm:$0xff] %v1605_v18   ;;  %v1073_v9 = vmul.f32 %v2029_v3, %v2599_v35  ;;  %2050 = vpow2.f32 %v951_v54  ;;  %v865_v13 = vsub.f32 0.0, %v2809_v2  ;;  %v765_v20 = vmul.f32 %v2655_v44, %v2484_v32 }
 0x18d   : > { %v2033_v26 = vpop.eup %2032  ;;  %1725 = vst [vmem:[%s2698_s28 + $0x70] sm:$0xff] %v1665_v51   ;;  %v1097_v21 = vmul.f32 %v2031_v27, %v2619_v0  ;;  %2052 = vpow2.f32 %v899_v38  ;;  %v844_v35 = vsub.f32 0.0, %v2814_v48  ;;  %v739_v54 = vmul.f32 %v2484_v32, %v2663_v11 }
 0x18e   : > { %v2035_v52 = vpop.eup %2034  ;;  %v1076_v57 = vmul.f32 %v2033_v26, %v2626_v62  ;;  %2054 = vpow2.f32 %v947_v42  ;;  %v953_v0 = vmul.f32 1.442695, %v865_v13  ;;  %v2826_v38 = vadd.f32 %v2489_v34, %v765_v20 }
 0x18f   : > { %v2037_v45 = vpop.eup %2036  ;;  %v1007_v50 = vadd.f32 1.0, %v2035_v52  ;;  %2056 = vpow2.f32 %v909_v10  ;;  %v911_v62 = vmul.f32 1.442695, %v844_v35  ;;  %v2832_v43 = vadd.f32 %v2489_v34, %v739_v54 }
 0x190   : > { %v2039_v25 = vpop.eup %2038  ;;  %v1620_v40 = vpack.c.bf16 %v1076_v57, %v1075_v55  ;;  %v1100_v44 = vmul.f32 %v2037_v45, %v2631_v12  ;;  %2058 = vpow2.f32 %v957_v49  ;;  %v868_v11 = vsub.f32 0.0, %v2826_v38 }
 0x191   : > { %v2041_v42 = vpop.eup %2040  ;;  %v1074_v59 = vmul.f32 %v2039_v25, %v2635_v15  ;;  %2060 = vrcp.f32 %v1007_v50  ;;  %v763_v12 = vmul.f32 %v2484_v32, %v2665_v63  ;;  %v842_v18 = vsub.f32 0.0, %v2832_v43 }
 0x192   : > { %v2043_v10 = vpop.eup %2042  ;;  %1716 = vst [vmem:[%s2698_s28 + $0x28] sm:$0xff] %v1620_v40   ;;  %v1680_v4 = vpack.c.bf16 %v1100_v44, %v1099_v36  ;;  %v1098_v46 = vmul.f32 %v2041_v42, %v2670_v14  ;;  %2062 = vpow2.f32 %v905_v56  ;;  %v959_v15 = vmul.f32 1.442695, %v868_v11 }
 0x193   : > { %v2045_v19 = vpop.eup %2044  ;;  %v1615_v30 = vpack.c.bf16 %v1074_v59, %v1073_v9  ;;  %2064 = vpow2.f32 %v953_v0  ;;  %v2842_v14 = vadd.f32 %v2489_v34, %v763_v12  ;;  %v744_v63 = vmul.f32 %v2692_v1, %v2484_v32 }
 0x194   : > { %v2047_v22 = vpop.eup %2046  ;;  %1728 = vst [vmem:[%s2698_s28 + $0x88] sm:$0xff] %v1680_v4   ;;  %v1675_v49 = vpack.c.bf16 %v1098_v46, %v1097_v21  ;;  %v981_v31 = vadd.f32 1.0, %v2045_v19  ;;  %2066 = vpow2.f32 %v911_v62  ;;  %v768_v36 = vmul.f32 %v2694_v6, %v2484_v32 }
 0x195   : > { %v2049_v55 = vpop.eup %2048  ;;  %1715 = vst [vmem:[%s2698_s28 + $0x20] sm:$0xff] %v1615_v30   ;;  %v1005_v29 = vadd.f32 1.0, %v2047_v22  ;;  %2068 = vpow2.f32 %v959_v15  ;;  %v866_v56 = vsub.f32 0.0, %v2842_v14  ;;  %v2851_v26 = vadd.f32 %v2489_v34, %v744_v63 }
 0x196   : > { %v2051_v3 = vpop.eup %2050  ;;  %1727 = vst [vmem:[%s2698_s28 + $0x80] sm:$0xff] %v1675_v49   ;;  %2070 = vrcp.f32 %v981_v31  ;;  %v984_v51 = vadd.f32 1.0, %v2049_v55  ;;  %v2854_v1 = vadd.f32 %v2489_v34, %v768_v36  ;;  %v742_v20 = vmul.f32 %v2484_v32, %v2701_v61 }
 0x197   : > { %v2053_v27 = vpop.eup %2052  ;;  %2072 = vrcp.f32 %v1005_v29  ;;  %v1008_v9 = vadd.f32 1.0, %v2051_v3  ;;  %v907_v57 = vmul.f32 1.442695, %v842_v18  ;;  %v847_v35 = vsub.f32 0.0, %v2851_v26 }
 0x198   : > { %v2055_v21 = vpop.eup %2054  ;;  %2074 = vrcp.f32 %v984_v51  ;;  %v982_v13 = vadd.f32 1.0, %v2053_v27  ;;  %v871_v50 = vsub.f32 0.0, %v2854_v1  ;;  %v2861_v0 = vadd.f32 %v2489_v34, %v742_v20 }
 0x199   : > { %v2057_v52 = vpop.eup %2056  ;;  %2076 = vrcp.f32 %v1008_v9  ;;  %v1006_v6 = vadd.f32 1.0, %v2055_v21  ;;  %v1079_v40 = vmul.f32 %v2043_v10, %v2677_v23  ;;  %v766_v61 = vmul.f32 %v2484_v32, %v2703_v7 }
 0x19a   : > { %v2059_v54 = vpop.eup %2058  ;;  %2078 = vrcp.f32 %v982_v13  ;;  %v987_v45 = vadd.f32 1.0, %v2057_v52  ;;  %v955_v42 = vmul.f32 1.442695, %v866_v56  ;;  %v917_v59 = vmul.f32 1.442695, %v847_v35 }
 0x19b   : > { %v2061_v25 = vpop.eup %2060  ;;  %2080 = vrcp.f32 %v1006_v6  ;;  %v1011_v44 = vadd.f32 1.0, %v2059_v54  ;;  %v845_v11 = vsub.f32 0.0, %v2861_v0  ;;  %v2870_v12 = vadd.f32 %v2489_v34, %v766_v61 }
 0x19c   : > { %v2063_v62 = vpop.eup %2062  ;;  %2082 = vrcp.f32 %v987_v45  ;;  %v745_v23 = vmul.f32 %v2710_v17, %v2484_v32  ;;  %v1103_v19 = vmul.f32 %v2061_v25, %v2685_v24  ;;  %v965_v7 = vmul.f32 1.442695, %v871_v50 }
 0x19d   : > { %v2867_v4 = vpop.eup %2064  ;;  %2084 = vrcp.f32 %v1011_v44  ;;  %v985_v46 = vadd.f32 1.0, %v2063_v62  ;;  %v769_v30 = vmul.f32 %v2712_v8, %v2484_v32  ;;  %v913_v49 = vmul.f32 1.442695, %v845_v11 }
 0x19e   : > { %v2067_v10 = vpop.eup %2066  ;;  %2086 = vpow2.f32 %v907_v57  ;;  %v869_v31 = vsub.f32 0.0, %v2870_v12  ;;  %v2879_v18 = vadd.f32 %v2489_v34, %v745_v23  ;;  %v743_v24 = vmul.f32 %v2484_v32, %v2723_v5 }
 0x19f   : > { %v2069_v15 = vpop.eup %2068  ;;  %v988_v22 = vadd.f32 1.0, %v2067_v10  ;;  %2088 = vrcp.f32 %v985_v46  ;;  %v2882_v17 = vadd.f32 %v2489_v34, %v769_v30 }
 0x1a0   : > { %v2071_v55 = vpop.eup %2070  ;;  %v1012_v29 = vadd.f32 1.0, %v2069_v15  ;;  %v961_v3 = vmul.f32 1.442695, %v869_v31  ;;  %v848_v51 = vsub.f32 0.0, %v2879_v18  ;;  %v2891_v56 = vadd.f32 %v2489_v34, %v743_v24 }
 0x1a1   : > { %v2073_v63 = vpop.eup %2072  ;;  %v1077_v8 = vmul.f32 %v2071_v55, %v2719_v16  ;;  %2090 = vrcp.f32 %v988_v22  ;;  %v872_v9 = vsub.f32 0.0, %v2882_v17  ;;  %v767_v16 = vmul.f32 %v2484_v32, %v2725_v39 }
 0x1a2   : > { %v2075_v36 = vpop.eup %2074  ;;  %v1101_v27 = vmul.f32 %v2073_v63, %v2740_v41  ;;  %2092 = vrcp.f32 %v1012_v29  ;;  %v919_v5 = vmul.f32 1.442695, %v848_v51  ;;  %v846_v6 = vsub.f32 0.0, %v2891_v56 }
 0x1a3   : > { %v2077_v21 = vpop.eup %2076  ;;  %v1080_v13 = vmul.f32 %v2075_v36, %v2743_v53  ;;  %2094 = vpow2.f32 %v955_v42  ;;  %v967_v41 = vmul.f32 1.442695, %v872_v9  ;;  %v2900_v53 = vadd.f32 %v2489_v34, %v767_v16 }
 0x1a4   : > { %v2079_v20 = vpop.eup %2078  ;;  %v1104_v52 = vmul.f32 %v2077_v21, %v2752_v33  ;;  %2096 = vpow2.f32 %v917_v59  ;;  %v915_v33 = vmul.f32 1.442695, %v846_v6 }
 0x1a5   : > { %v2081_v57 = vpop.eup %2080  ;;  %v1630_v35 = vpack.c.bf16 %v1080_v13, %v1079_v40  ;;  %v1078_v54 = vmul.f32 %v2079_v20, %v2762_v37  ;;  %2098 = vpow2.f32 %v965_v7  ;;  %v870_v40 = vsub.f32 0.0, %v2900_v53 }
 0x1a6   : > { %v2083_v45 = vpop.eup %2082  ;;  %v1690_v32 = vpack.c.bf16 %v1104_v52, %v1103_v19  ;;  %v1102_v39 = vmul.f32 %v2081_v57, %v2770_v60  ;;  %2100 = vpow2.f32 %v913_v49  ;;  %v1009_v60 = vadd.f32 1.0, %v2867_v4 }
 0x1a7   : > { %v2085_v50 = vpop.eup %2084  ;;  %1718 = vst [vmem:[%s2698_s28 + $0x38] sm:$0xff] %v1630_v35   ;;  %v1625_v25 = vpack.c.bf16 %v1078_v54, %v1077_v8  ;;  %2102 = vpow2.f32 %v961_v3  ;;  %v963_v61 = vmul.f32 1.442695, %v870_v40  ;;  %v1083_v11 = vmul.f32 %v2083_v45, %v2774_v58 }
 0x1a8   : > { %v2087_v44 = vpop.eup %2086  ;;  %1730 = vst [vmem:[%s2698_s28 + $0x98] sm:$0xff] %v1690_v32   ;;  %v1685_v37 = vpack.c.bf16 %v1102_v39, %v1101_v27  ;;  %2104 = vpow2.f32 %v919_v5  ;;  %v1107_v10 = vmul.f32 %v2085_v50, %v2782_v28 }
 0x1a9   : > { %1717 = vst [vmem:[%s2698_s28 + $0x30] sm:$0xff] %v1625_v25   ;;  %v986_v34 = vadd.f32 1.0, %v2087_v44  ;;  %2106 = vpow2.f32 %v967_v41  ;;  %v2089_v62 = vpop.eup %2088 }
 0x1aa   : > { %1729 = vst [vmem:[%s2698_s28 + $0x90] sm:$0xff] %v1685_v37   ;;  %2108 = vpow2.f32 %v915_v33  ;;  %v1081_v27 = vmul.f32 %v2089_v62, %v2793_v47 }
 0x1ab   : > { %v2091_v42 = vpop.eup %2090  ;;  %2110 = vrcp.f32 %v986_v34 }
 0x1ac   : > { %v2093_v59 = vpop.eup %2092  ;;  %v1084_v46 = vmul.f32 %v2091_v42, %v2814_v48  ;;  %2112 = vpow2.f32 %v963_v61 }
 0x1ad   : > { %v2095_v23 = vpop.eup %2094  ;;  %v1108_v19 = vmul.f32 %v2093_v59, %v2826_v38  ;;  %2114 = vrcp.f32 %v1009_v60 }
 0x1ae   : > { %v2097_v7 = vpop.eup %2096  ;;  %v1640_v30 = vpack.c.bf16 %v1084_v46, %v1083_v11  ;;  %v1010_v4 = vadd.f32 1.0, %v2095_v23 }
 0x1af   : > { %v2099_v15 = vpop.eup %2098  ;;  %v1700_v22 = vpack.c.bf16 %v1108_v19, %v1107_v10  ;;  %v991_v49 = vadd.f32 1.0, %v2097_v7 }
 0x1b0   : > { %v2101_v31 = vpop.eup %2100  ;;  %1720 = vst [vmem:[%s2698_s28 + $0x48] sm:$0xff] %v1640_v30   ;;  %2116 = vrcp.f32 %v1010_v4  ;;  %v1015_v58 = vadd.f32 1.0, %v2099_v15 }
 0x1b1   : > { %v2103_v55 = vpop.eup %2102  ;;  %1732 = vst [vmem:[%s2698_s28 + $0xa8] sm:$0xff] %v1700_v22   ;;  %2118 = vrcp.f32 %v991_v49  ;;  %v989_v48 = vadd.f32 1.0, %v2101_v31 }
 0x1b2   : > { %v2105_v29 = vpop.eup %2104  ;;  %2120 = vrcp.f32 %v1015_v58  ;;  %v1013_v28 = vadd.f32 1.0, %v2103_v55 }
 0x1b3   : > { %v2107_v24 = vpop.eup %2106  ;;  %2122 = vrcp.f32 %v989_v48  ;;  %v992_v38 = vadd.f32 1.0, %v2105_v29 }
 0x1b4   : > { %v2109_v63 = vpop.eup %2108  ;;  %2124 = vrcp.f32 %v1013_v28  ;;  %v1016_v8 = vadd.f32 1.0, %v2107_v24 }
 0x1b5   : > { %v2111_v3 = vpop.eup %2110  ;;  %2126 = vrcp.f32 %v992_v38  ;;  %v990_v51 = vadd.f32 1.0, %v2109_v63 }
 0x1b6   : > { %v2113_v36 = vpop.eup %2112  ;;  %v1082_v9 = vmul.f32 %v2111_v3, %v2832_v43  ;;  %2128 = vrcp.f32 %v1016_v8 }
 0x1b7   : > { %2130 = vrcp.f32 %v990_v51  ;;  %v1014_v21 = vadd.f32 1.0, %v2113_v36  ;;  %v2115_v13 = vpop.eup %2114 }
 0x1b8   : > { %v1635_v5 = vpack.c.bf16 %v1082_v9, %v1081_v27  ;;  %v1105_v52 = vmul.f32 %v2115_v13, %v2809_v2 }
 0x1b9   : > { %2132 = vrcp.f32 %v1014_v21 }
 0x1ba   : > { %v2117_v16 = vpop.eup %2116  ;;  %1719 = vst [vmem:[%s2698_s28 + $0x40] sm:$0xff] %v1635_v5  }
 0x1bb   : > { %v2119_v20 = vpop.eup %2118  ;;  %v1106_v41 = vmul.f32 %v2117_v16, %v2842_v14 }
 0x1bc   : > { %v2121_v6 = vpop.eup %2120  ;;  %v1087_v45 = vmul.f32 %v2119_v20, %v2851_v26 }
 0x1bd   : > { %v2123_v47 = vpop.eup %2122  ;;  %v1695_v57 = vpack.c.bf16 %v1106_v41, %v1105_v52  ;;  %v1111_v33 = vmul.f32 %v2121_v6, %v2854_v1 }
 0x1be   : > { %v2125_v43 = vpop.eup %2124  ;;  %v1085_v14 = vmul.f32 %v2123_v47, %v2861_v0 }
 0x1bf   : > { %v2127_v35 = vpop.eup %2126  ;;  %1731 = vst [vmem:[%s2698_s28 + $0xa0] sm:$0xff] %v1695_v57  }
 0x1c0   : > { %v2129_v54 = vpop.eup %2128  ;;  %v1088_v32 = vmul.f32 %v2127_v35, %v2879_v18  ;;  %v1109_v18 = vmul.f32 %v2125_v43, %v2870_v12 }
 0x1c1   : > { %v2131_v39 = vpop.eup %2130  ;;  %v1112_v2 = vmul.f32 %v2129_v54, %v2882_v17 }
 0x1c2   : > { %v1650_v50 = vpack.c.bf16 %v1088_v32, %v1087_v45  ;;  %v1086_v25 = vmul.f32 %v2131_v39, %v2891_v56 }
 0x1c3   : > { %v2133_v26 = vpop.eup %2132  ;;  %v1710_v40 = vpack.c.bf16 %v1112_v2, %v1111_v33 }
 0x1c4   : > { %1722 = vst [vmem:[%s2698_s28 + $0x58] sm:$0xff] %v1650_v50   ;;  %v1645_v44 = vpack.c.bf16 %v1086_v25, %v1085_v14  ;;  %v1110_v1 = vmul.f32 %v2133_v26, %v2900_v53 }
 0x1c5   : > { %1734 = vst [vmem:[%s2698_s28 + $0xb8] sm:$0xff] %v1710_v40  }
 0x1c6   : > { %1721 = vst [vmem:[%s2698_s28 + $0x50] sm:$0xff] %v1645_v44   ;;  %v1705_v0 = vpack.c.bf16 %v1110_v1, %v1109_v18 }
 0x1c8   : > { %1733 = vst [vmem:[%s2698_s28 + $0xb0] sm:$0xff] %v1705_v0  }
 0x1c9   : > { %2205 = shalt.err (!%p2202_p7)
}
 0x1ca   : > { %s2206_s5 = scalar_lea.hbm %s2936_s29, 3072  ;;  %s2210_s23 = scalar_lea.hbm %s2988_s4, 6144 }
 0x1cb   : > { %p2207_p9 = scmp.ne.s32.totalorder %s2936_s29, %s2206_s5  ;;  %p2211_p5 = scmp.lt.u32.totalorder %s2936_s29, %s2988_s4 }
 0x1cc   : > { %p2212_p13 = scmp.lt.u32.totalorder %s2210_s23, %s2206_s5  ;;  %p2214_p4 = scmp.lt.u32.totalorder %s2206_s5, %s2936_s29 }
 0x1cd   : > { %p2208_p1 = pnand %p2207_p9, %p2390_p12 }
 0x1ce   : > { %p2213_p2 = por %p2212_p13, %p2211_p5 }
 0x1cf   : > { %p2209_p0 = pneg %p2208_p1 }
 0x1d0   : > { %p2215_p6 = por %p2214_p4, %p2213_p2 }
 0x1d2   : > { %p2216_p8 = pnand %p2215_p6, %p2209_p0 }
 0x1d4   : > { %2219 = shalt.err (!%p2216_p8)
}
 0x1d5   : > { %s2269_s28 = smov 64   ;;  %s2270_s9 = smov 4  }
 0x1d6   : > { %1855 = dma.vmem_to_hbm [thread:$0]  (%p2390_p12), %s2938_s10, 3072, %s2936_s29, %s1354_s26, %s2269_s28, %s2269_s28, %s2270_s9  }
 0x1d7 PF: > { %s1382_s25 = sand.u32 1, %s2250_s15   ;;  %p3003_p10 = scmp.ne.s32.totalorder %s2993_s22, 0 }
 0x1d8   : > { %p3004_p11 = scmp.ge.s32.totalorder %s2262_s18, 2  ;;  %s1383_s19 = scalar_lea.sflag [#allocation4], %s1382_s25 }
 0x1da   : > { %p1866_p3 = pnand %p3004_p11, %p3003_p10 }
 0x1dc   : > { %2245 = dma.done.wait (!%p1866_p3), %s1383_s19, 3072  }
 0x1dd   : > { %2247 = vsyncadd (!%p1866_p3), %s1383_s19, 4294964224  ;;  %p18_p7 = scmp.ge.s32.totalorder %s2352_s27, 4   ;;  %s3005_s15 = smov %s2254_s16 }
 0x1de   : > { %s3006_s16 = smov %s2258_s17  ;;  %s3007_s17 = smov %s2386_s24 }
 0x1df   : > { %s3008_s18 = smov %s2352_s27  ;;  %20 = sbr.rel (!%p18_p7) target bundleno = 6 (0x6), region = 85 }
 0x1e6   :  { %1388 = vsyncpa [#allocation3], 1 }
 0x1e7   :  { %1390 = vsyncpa [#allocation3 + $0x1], 1 }
 0x1e8   :  { %1391 = vsyncpa [#allocation6], 1 }
 0x1e9   :  { %1392 = vsyncpa [#allocation4], 1 }
 0x1ea   :  { %1394 = vsyncpa [#allocation4 + $0x1], 1 }

</bundles_post_ra>
